<compile_context>
chip_gen: v7x
topology: tpu7x:2x2x1
jax: 0.10.0
libtpu: 0.0.40
codegen_flags: <defaults>
</compile_context>

<pallas_src>
import jax
import jax.numpy as jnp
from jax.experimental import pallas as pl
from jax.experimental.pallas import tpu as pltpu


FEATURES = 200       # nn.Linear(200, classes) in_features
CLASSES = 10         # small example class count
BATCH = 8            # small example batch

C_PAD = 128          # class (lane) dim padded to one full lane width
TB_MAX = 1024        # max batch-tile rows (per-step overhead amortized; VMEM tiny)
SINGLE_BLOCK_MAX = 256  # above this, force >= 2 grid blocks (v7x megacore)
ROW_ALIGN = 16       # batch tiles 16-row aligned (safe for bf16 output packing)

# Set to ~128 in production to bypass pallas_call launch overhead for tiny
# batches with a single fused XLA dot; kept 0 here so the demo runs the kernel.
TINY_BATCH_XLA_MAX = 0


def _round_up(n, m):
    return ((n + m - 1) // m) * m


def _round_down(n, m):
    return (n // m) * m


def _pick_batch_tile(b_rows):
    """Batch tile: multiple of ROW_ALIGN, <= b_rows (ragged last block is
    masked by Pallas), capped at TB_MAX; batches > SINGLE_BLOCK_MAX get a
    ~half-size tile so both v7x TensorCores receive a block."""
    if b_rows <= SINGLE_BLOCK_MAX:
        return _round_down(b_rows, ROW_ALIGN)
    half = _round_up(-(-b_rows // 2), ROW_ALIGN)
    return min(TB_MAX, half)


def linear_eval_kernel(x_ref, w_ref, b_ref, o_ref):
    # x_ref: [TB, F]     f32   (raw activations; cast to bf16 in-kernel)
    # w_ref: [F, C_PAD]  bf16  (grid-resident W^T, lane-padded with zeros)
    # b_ref: [1, C_PAD]  f32   (grid-resident bias, lane-padded with zeros)
    # o_ref: [TB, C_PAD] bf16
    x = x_ref[...].astype(jnp.bfloat16)
    acc = jnp.dot(x, w_ref[...], preferred_element_type=jnp.float32)
    # Bias-add epilogue in f32 (v5e-safe), round once to bf16 on the way out.
    o_ref[...] = (acc + b_ref[...]).astype(o_ref.dtype)


def prepare_linear_head(weight, bias):
    """One-time prep of the (frozen / slowly-updated) probe head.

    Transposes weight to [F, C], zero-pads the class dim to C_PAD, casts to
    bf16, and zero-pads bias to [1, C_PAD] in f32.  Padded lanes are zero so
    they contribute nothing to the un-padded output columns.  The feature
    (contraction) dim is left at its native size — no K padding needed.
    """
    c, f = weight.shape
    w_t = jnp.zeros((f, C_PAD), dtype=jnp.bfloat16)
    w_t = w_t.at[:, :c].set(weight.T.astype(jnp.bfloat16))
    b = jnp.zeros((1, C_PAD), dtype=jnp.float32)
    b = b.at[0, :c].set(bias.astype(jnp.float32))
    return w_t, b


def linear_evaluation_forward(x, w_t_pad, b_pad, classes,
                              tiny_batch_xla_max=TINY_BATCH_XLA_MAX):
    """Forward pass of LinearEvaluation.

    encoding = simclr(x)   (frozen encoder + Identity projection)
    pred     = encoding @ weight.T + bias
    """
    # TODO(synk): the concrete frozen SimCLR conv backbone is an external
    # module in the reference code and is modeled as Identity here.
    encoding = x
    B, F = encoding.shape

    if B <= tiny_batch_xla_max:
        # Tiny batches: one fused XLA dot beats the pallas_call fixed overhead.
        return encoding @ w_t_pad[:, :classes].astype(encoding.dtype) + b_pad[0, :classes]

    # Only pad the batch if it is smaller than the minimum aligned tile;
    # otherwise the ragged last grid block is handled by Pallas masking.
    if B < ROW_ALIGN:
        encoding = jnp.pad(encoding, ((0, ROW_ALIGN - B), (0, 0)))
    b_rows = encoding.shape[0]

    TB = _pick_batch_tile(b_rows)
    num_blocks = pl.cdiv(b_rows, TB)

    cost = pl.CostEstimate(
        flops=2 * b_rows * F * C_PAD,
        transcendentals=0,
        bytes_accessed=(b_rows * F * 4          # x (f32, read once, in-kernel cast)
                        + F * C_PAD * 2          # W^T (bf16, grid-resident)
                        + C_PAD * 4              # bias (f32)
                        + b_rows * C_PAD * 2),   # out (bf16)
    )

    out = pl.pallas_call(
        linear_eval_kernel,
        out_shape=jax.ShapeDtypeStruct((b_rows, C_PAD), jnp.bfloat16),
        grid=(num_blocks,),
        in_specs=[
            pl.BlockSpec((TB, F), lambda i: (i, 0)),       # raw f32 activations
            pl.BlockSpec((F, C_PAD), lambda i: (0, 0)),    # resident bf16 W^T
            pl.BlockSpec((1, C_PAD), lambda i: (0, 0)),    # resident f32 bias
        ],
        out_specs=pl.BlockSpec((TB, C_PAD), lambda i: (i, 0)),
        compiler_params=pltpu.CompilerParams(
            dimension_semantics=("parallel",),
        ),
        cost_estimate=cost,
    )(encoding, w_t_pad, b_pad)

    # Slice off lane padding (padded cols are bias-only) and any tiny row pad.
    return out[:B, :classes]


if __name__ == "__main__":
    key = jax.random.PRNGKey(0)
    kx, kw, kb, kx2 = jax.random.split(key, 4)

    # Deterministic nn.Linear(200, CLASSES) init: U(-1/sqrt(F), 1/sqrt(F))
    bound = 1.0 / jnp.sqrt(jnp.float32(FEATURES))
    weight = jax.random.uniform(
        kw, (CLASSES, FEATURES), dtype=jnp.float32, minval=-bound, maxval=bound
    )
    bias = jax.random.uniform(
        kb, (CLASSES,), dtype=jnp.float32, minval=-bound, maxval=bound
    )

    # One-time head prep (hoisted out of the forward path).
    w_t_pad, b_pad = prepare_linear_head(weight, bias)

    # --- Small batch: single grid block, in-kernel cast + masked row pad ---
    x = jax.random.normal(kx, (BATCH, FEATURES), dtype=jnp.float32)
    pred = linear_evaluation_forward(x, w_t_pad, b_pad, CLASSES)
    pred = jax.block_until_ready(pred)
    ref = x @ weight.T + bias
    assert pred.shape == (BATCH, CLASSES)
    assert jnp.allclose(pred.astype(jnp.float32), ref, atol=3e-2, rtol=3e-2)

    # --- Larger ragged batch: 2 parallel blocks, ragged last block masked ---
    B2 = 600
    x2 = jax.random.normal(kx2, (B2, FEATURES), dtype=jnp.float32)
    pred2 = linear_evaluation_forward(x2, w_t_pad, b_pad, CLASSES)
    pred2 = jax.block_until_ready(pred2)
    ref2 = x2 @ weight.T + bias
    assert pred2.shape == (B2, CLASSES)
    assert jnp.allclose(pred2.astype(jnp.float32), ref2, atol=3e-2, rtol=3e-2)

    print("KERNEL_OK")
</pallas_src>

<mosaic_0001>
module attributes {stable_mosaic.version = 11 : i64} {
  func.func @linear_eval_kernel(%arg0: i32, %arg1: memref<16x200xf32, #tpu.memory_space<vmem>>, %arg2: memref<200x128xbf16, #tpu.memory_space<vmem>>, %arg3: memref<1x128xf32, #tpu.memory_space<vmem>>, %arg4: memref<16x128xbf16, #tpu.memory_space<vmem>>) attributes {dimension_semantics = [#tpu.dimension_semantics<parallel>], iteration_bounds = array<i64: 1>, scalar_prefetch = 0 : i64, scratch_operands = 0 : i64, tpu.core_type = #tpu.core_type<tc>, window_params = [{transform_indices = @transform_0, window_bounds = array<i64: 16, 200>}, {pipeline_mode = #tpu.pipeline_mode<synchronous>, transform_indices = @transform_1, window_bounds = array<i64: 200, 128>}, {pipeline_mode = #tpu.pipeline_mode<synchronous>, transform_indices = @transform_2, window_bounds = array<i64: 1, 128>}, {transform_indices = @transform_3, window_bounds = array<i64: 16, 128>}]} {
    %c0 = arith.constant 0 : index
    %c0_0 = arith.constant 0 : index
    %0 = vector.load %arg1[%c0, %c0_0] : memref<16x200xf32, #tpu.memory_space<vmem>>, vector<16x200xf32>
    %1 = arith.truncf %0 : vector<16x200xf32> to vector<16x200xbf16>
    %c0_1 = arith.constant 0 : index
    %c0_2 = arith.constant 0 : index
    %2 = vector.load %arg2[%c0_1, %c0_2] : memref<200x128xbf16, #tpu.memory_space<vmem>>, vector<200x128xbf16>
    %cst = arith.constant dense<0.000000e+00> : vector<16x128xf32>
    %3 = tpu.matmul %1, %2, %cst {dimension_numbers = #tpu.dot_dimension_numbers<[1], [0], [0], [1], [0, 0, 1, 1], [], []>} : vector<16x200xbf16>, vector<200x128xbf16>, vector<16x128xf32> -> vector<16x128xf32>
    %c0_3 = arith.constant 0 : index
    %c0_4 = arith.constant 0 : index
    %4 = vector.load %arg3[%c0_3, %c0_4] : memref<1x128xf32, #tpu.memory_space<vmem>>, vector<1x128xf32>
    %5 = vector.broadcast %4 : vector<1x128xf32> to vector<16x128xf32>
    %6 = arith.addf %3, %5 : vector<16x128xf32>
    %7 = arith.truncf %6 : vector<16x128xf32> to vector<16x128xbf16>
    %c0_5 = arith.constant 0 : index
    %c0_6 = arith.constant 0 : index
    %8 = vector.load %arg4[%c0_5, %c0_6] : memref<16x128xbf16, #tpu.memory_space<vmem>>, vector<16x128xbf16>
    tpu.vector_store %arg4[%c0_5, %c0_6], %7 {strides = array<i32>} : memref<16x128xbf16, #tpu.memory_space<vmem>>, vector<16x128xbf16>,
    return
  }
  func.func @transform_0(%arg0: i32) -> (i32, i32) {
    %c0_i32 = arith.constant 0 : i32
    %c0_i32_0 = arith.constant 0 : i32
    return %arg0, %c0_i32 : i32, i32
  }
  func.func @transform_1(%arg0: i32) -> (i32, i32) {
    %c0_i32 = arith.constant 0 : i32
    %c0_i32_0 = arith.constant 0 : i32
    %c0_i32_1 = arith.constant 0 : i32
    return %c0_i32, %c0_i32_0 : i32, i32
  }
  func.func @transform_2(%arg0: i32) -> (i32, i32) {
    %c0_i32 = arith.constant 0 : i32
    %c0_i32_0 = arith.constant 0 : i32
    %c0_i32_1 = arith.constant 0 : i32
    return %c0_i32, %c0_i32_0 : i32, i32
  }
  func.func @transform_3(%arg0: i32) -> (i32, i32) {
    %c0_i32 = arith.constant 0 : i32
    %c0_i32_0 = arith.constant 0 : i32
    return %arg0, %c0_i32 : i32, i32
  }
}

</mosaic_0001>

<bundles_post_ra>
// kernel: tpu_custom_call.1
= control target key start
LH: loop header
LB: loop body
LE: loop exit
PB: predicated region body
PF: predicated region fallthrough
CT: control target
= control target key end

     0   :  { %8 = vsyncpa [#allocation3], 0  ;;  %s424_s0 = inlined_call_operand.hbm [shape: f32[16,200], index: 0, kind: input, shape index: {}]   ;;  %s425_s1 = inlined_call_operand.hbm [shape: bf16[200,128], index: 1, kind: input, shape index: {}]   ;;  %s426_s2 = inlined_call_operand.vmem [shape: f32[1,128], index: 2, kind: input, shape index: {}]   ;;  %s427_s3 = inlined_call_operand.hbm [shape: bf16[16,128], index: 3, kind: output, shape index: {}]  }
   0x1   :  { %9 = vsyncpa [#allocation6], 0 }
   0x2   :  { %10 = vsyncpa [#allocation4], 0  ;;  %s351_s12 = smov [#allocation2]   ;;  %s279_s16 = scalar_lea.hbm %s424_s0, 512 }
   0x3   :  { %s16_s13 = sshll.u32 %s351_s12, 4  ;;  %p280_p0 = scmp.ne.s32.totalorder %s424_s0, %s279_s16  ;;  %s17_s13 = int_to_ptr.vmem [resolvable:$true] %s16_s13 }
   0x4   :  { %p283_p1 = scmp.lt.u32.totalorder %s279_s16, %s424_s0 }
   0x6   :  { %p285_p2 = pnand %p283_p1, %p280_p0 }
   0x8   :  { %288 = shalt.err (!%p285_p2)
}
   0x9   :  { %s289_s21 = scalar_lea.vmem %s17_s13, 512  ;;  %p294_p4 = scmp.lt.s32.totalorder %s17_s13, %s17_s13 }
   0xa   :  { %p290_p3 = scmp.ne.s32.totalorder %s17_s13, %s289_s21  ;;  %p295_p5 = scmp.lt.s32.totalorder %s289_s21, %s289_s21 }
   0xc   :  { %p296_p6 = por %p295_p5, %p294_p4 }
   0xe   :  { %p297_p7 = pnand %p296_p6, %p290_p3 }
  0x10   :  { %300 = shalt.err (!%p297_p7)
}
  0x11   :  { %s352_s22 = smov 256   ;;  %s353_s23 = smov 16  }
  0x12   :  { %22 = dma.hbm_to_vmem [thread:$0]  %s424_s0, 512, %s17_s13, [#allocation3], %s352_s22, %s352_s22, %s353_s23  }
  0x13   :  { %s354_s26 = smov [#allocation5]   ;;  %s301_s30 = scalar_lea.hbm %s425_s1, 1600 }
  0x14   :  { %s28_s27 = sshll.u32 %s354_s26, 4  ;;  %p302_p8 = scmp.ne.s32.totalorder %s425_s1, %s301_s30  ;;  %s29_s27 = int_to_ptr.vmem [resolvable:$true] %s28_s27 }
  0x15   :  { %p305_p9 = scmp.lt.u32.totalorder %s301_s30, %s425_s1 }
  0x17   :  { %p307_p10 = pnand %p305_p9, %p302_p8 }
  0x19   :  { %310 = shalt.err (!%p307_p10)
}
  0x1a   :  { %s311_s8 = scalar_lea.vmem %s29_s27, 1600  ;;  %p316_p12 = scmp.lt.s32.totalorder %s29_s27, %s29_s27 }
  0x1b   :  { %p312_p11 = scmp.ne.s32.totalorder %s29_s27, %s311_s8  ;;  %p317_p13 = scmp.lt.s32.totalorder %s311_s8, %s311_s8 }
  0x1d   :  { %p318_p0 = por %p317_p13, %p316_p12 }
  0x1f   :  { %p319_p1 = pnand %p318_p0, %p312_p11 }
  0x21   :  { %322 = shalt.err (!%p319_p1)
}
  0x22   :  { %s355_s0 = smov 64   ;;  %s356_s9 = smov 4  }
  0x23   :  { %34 = dma.hbm_to_vmem [thread:$0]  %s425_s1, 1600, %s29_s27, [#allocation6], %s355_s0, %s355_s0, %s356_s9  }
  0x24   :  { %345 = dma.done.wait [#allocation3], 512  }
  0x25   :  { %346 = vsyncadd [#allocation3], 4294966784 }
  0x26   :  { %347 = dma.done.wait [#allocation6], 1600  }
  0x27   :  { %348 = vsyncadd [#allocation6], 4294965696  ;;  %v357_v0 = vmov 0   ;;  %v266_v1 = vld [vmem:[#allocation5] sm:$0xff]   ;;  %v267_v2 = vld [vmem:[#allocation5 + $0x8] sm:$0xff]   ;;  %vm157_vm0 = vcmask 588800  }
  0x28   :  { %165 = vmatprep.subr.bf16.mxu0 %v357_v0  ;;  %v268_v3 = vld [vmem:[#allocation5 + $0x10] sm:$0xff]   ;;  %v269_v4 = vld [vmem:[#allocation5 + $0x18] sm:$0xff]   ;;  %v45_v5 = vld [vmem:[#allocation2 + $0x8] sm:$0xff]  ;;  %vm161_vm1 = vcmask 1043456   ;;  %s358_s13 = smov [#allocation7]  }
  0x29   :  { %166 = vmatpush1.bf16.msra.mxu0 %v266_v1  ;;  %v47_v6 = vld [vmem:[#allocation2 + $0x18] sm:$0xff]  ;;  %v270_v7 = vld [vmem:[#allocation5 + $0x20] sm:$0xff]   ;;  %v271_v9 = vld [vmem:[#allocation5 + $0x28] sm:$0xff]   ;;  %s221_s14 = sshll.u32 %s358_s13, 4  ;;  %s222_s14 = int_to_ptr.vmem [resolvable:$true] %s221_s14 }
  0x2a   :  { %167 = vmatprep.subr.bf16.mxu0 %v357_v0  ;;  %v49_v8 = vpack.c.bf16 %v47_v6, %v45_v5  ;;  %v272_v10 = vld [vmem:[#allocation5 + $0x30] sm:$0xff]   ;;  %v273_v11 = vld [vmem:[#allocation5 + $0x38] sm:$0xff]   ;;  %v274_v12 = vld [vmem:[#allocation5 + $0x40] sm:$0xff]   ;;  %s323_s15 = scalar_lea.vmem %s222_s14, 128  ;;  %p328_p3 = scmp.lt.s32.totalorder %s222_s14, %s222_s14 }
  0x2b   :  { %v275_v13 = vld [vmem:[#allocation5 + $0x48] sm:$0xff]   ;;  %v276_v14 = vld [vmem:[#allocation5 + $0x50] sm:$0xff]   ;;  %v277_v15 = vld [vmem:[#allocation5 + $0x58] sm:$0xff]   ;;  %p324_p2 = scmp.ne.s32.totalorder %s222_s14, %s323_s15  ;;  %p329_p4 = scmp.lt.s32.totalorder %s323_s15, %s323_s15 }
  0x2c   :  { %248 = vmatprep.mubr.msk.bf16.mxu0 %vm157_vm0, %v49_v8  ;;  %v278_v16 = vld [vmem:[#allocation5 + $0x60] ss:$0 sps:$4 sm:$0xff]   ;;  %v46_v18 = vld [vmem:[#allocation2 + $0x10] sm:$0xff] }
  0x2d   :  { %168 = vmatpush1.bf16.msra.mxu0 %v267_v2  ;;  %v44_v17 = vld [vmem:[#allocation2] sm:$0xff]  ;;  %v163_v19 = vsel %vm161_vm1, %v278_v16, 0  ;;  %p330_p5 = por %p329_p4, %p328_p3 }
  0x2e   :  { %169 = vmatprep.subr.bf16.mxu0 %v357_v0  ;;  %v48_v20 = vpack.c.bf16 %v46_v18, %v44_v17  ;;  %v234_v21 = vld [vmem:[%s426_s2] ss:$0 sm:$0xff] }
  0x2f   :  { %p331_p6 = pnand %p330_p5, %p324_p2 }
  0x31   :  { %170 = vmatpush1.bf16.msra.mxu0 %v268_v3 }
  0x32   :  { %171 = vmatprep.subr.bf16.mxu0 %v357_v0 }
  0x35   :  { %172 = vmatpush1.bf16.msra.mxu0 %v269_v4 }
  0x36   :  { %173 = vmatprep.subr.bf16.mxu0 %v357_v0 }
  0x39   :  { %174 = vmatpush1.bf16.msra.mxu0 %v270_v7 }
  0x3a   :  { %175 = vmatprep.subr.bf16.mxu0 %v357_v0 }
  0x3d   :  { %176 = vmatpush1.bf16.msra.mxu0 %v271_v9 }
  0x3e   :  { %177 = vmatprep.subr.bf16.mxu0 %v357_v0 }
  0x41   :  { %178 = vmatpush1.bf16.msra.mxu0 %v272_v10 }
  0x42   :  { %179 = vmatprep.subr.bf16.mxu0 %v357_v0 }
  0x45   :  { %180 = vmatpush1.bf16.msra.mxu0 %v273_v11 }
  0x46   :  { %181 = vmatprep.subr.bf16.mxu0 %v357_v0 }
  0x49   :  { %182 = vmatpush1.bf16.msra.mxu0 %v274_v12 }
  0x4a   :  { %183 = vmatprep.subr.bf16.mxu0 %v357_v0 }
  0x4d   :  { %184 = vmatpush1.bf16.msra.mxu0 %v275_v13 }
  0x4e   :  { %185 = vmatprep.subr.bf16.mxu0 %v357_v0 }
  0x51   :  { %186 = vmatpush1.bf16.msra.mxu0 %v276_v14 }
  0x52   :  { %187 = vmatprep.subr.bf16.mxu0 %v357_v0 }
  0x55   :  { %188 = vmatpush1.bf16.msra.mxu0 %v277_v15 }
  0x56   :  { %189 = vmatprep.subr.bf16.mxu0 %v357_v0 }
  0x59   :  { %190 = vmatpush1.bf16.msra.mxu0 %v163_v19 }
  0x5c   :  { %198 = vmatmul.mubr.bf16.vlgmr.msra.gmra.mrb[0].mxu0 %v48_v20 }
 0x12f   :  { %v199_v22 = vpop.f32.mrb[0].mxu0 }
 0x130   :  { %v201_v23 = vpop.f32.mrb[1].mxu0  ;;  %v200_v25 = vadd.f32 %v234_v21, %v199_v22 }
 0x131   :  { %v202_v24 = vpop.f32.mrb[2].mxu0 }
 0x132   :  { %v203_v26 = vadd.f32 %v234_v21, %v202_v24  ;;  %v204_v27 = vpop.f32.mrb[3].mxu0 }
 0x134   :  { %v256_v28 = vpack.c.bf16 %v203_v26, %v200_v25 }
 0x136   :  { %257 = vst [vmem:[#allocation7] sm:$0xff] %v256_v28  }
 0x137   :  { %334 = shalt.err (!%p331_p6)
}
 0x138   :  { %s335_s17 = scalar_lea.hbm %s427_s3, 128 }
 0x139   :  { %p336_p7 = scmp.ne.s32.totalorder %s427_s3, %s335_s17  ;;  %p339_p8 = scmp.lt.u32.totalorder %s335_s17, %s427_s3 }
 0x13b   :  { %p341_p9 = pnand %p339_p8, %p336_p7 }
 0x13d   :  { %344 = shalt.err (!%p341_p9)
}
 0x13e   :  { %227 = dma.vmem_to_hbm [thread:$0]  %s222_s14, 128, %s427_s3, [#allocation4], %s355_s0, %s355_s0, %s356_s9  }
 0x13f   :  { %349 = dma.done.wait [#allocation4], 128  }
 0x140   :  { %350 = vsyncadd [#allocation4], 4294967168 }
 0x141   :  { %231 = vsyncpa [#allocation3], 1 }
 0x142   :  { %232 = vsyncpa [#allocation6], 1 }
 0x143   :  { %233 = vsyncpa [#allocation4], 1 }

</bundles_post_ra>
